<compile_context>
chip_gen: v5e
topology: v5e:2x2
jax: 0.10.0
libtpu: 0.0.40
codegen_flags: <defaults>
</compile_context>

<pallas_src>
import jax
import jax.numpy as jnp
from jax.experimental import pallas as pl
from jax.experimental.pallas import tpu as pltpu


def _make_cat_kernel(widths):
    """Kernel that copies each input block into its column slice of the output."""
    offsets = []
    off = 0
    for w in widths:
        offsets.append(off)
        off += w

    def kernel(*refs):
        in_refs = refs[:-1]
        o_ref = refs[-1]
        for r, o, w in zip(in_refs, offsets, widths):
            o_ref[:, o:o + w] = r[...]

    return kernel


def _sublane_multiple(dtype) -> int:
    itemsize = jnp.dtype(dtype).itemsize
    return {4: 8, 2: 16, 1: 32}.get(itemsize, 8)


def cat_dim1(xs, *, force_kernel: bool = False) -> jax.Array:
    """Concatenate a list of arrays along dim 1 (torch.cat(x, 1) semantics)."""
    xs = [jnp.asarray(x) for x in xs]
    assert len(xs) >= 1
    lead = int(xs[0].shape[0])
    trail = tuple(xs[0].shape[2:])
    dtype = xs[0].dtype
    for x in xs:
        assert x.ndim >= 2, "cat along dim 1 needs >= 2-D tensors"
        assert int(x.shape[0]) == lead and tuple(x.shape[2:]) == trail
        assert x.dtype == dtype

    if len(xs) == 1:
        return xs[0]

    out_nd_shape = (lead, sum(int(x.shape[1]) for x in xs)) + trail

    itemsize = jnp.dtype(dtype).itemsize
    total_bytes = sum(int(x.size) for x in xs) * itemsize
    # Small-input fast path: kernel launch overhead dwarfs the copy.
    if not force_kernel and total_bytes < (256 << 10):
        return jnp.concatenate(xs, axis=1)

    # Free (contiguous) flatten: (N, C_i, *rest) -> (N, C_i * prod(rest)).
    rest = 1
    for d in trail:
        rest *= int(d)
    flats = [x.reshape(lead, int(x.shape[1]) * rest) for x in xs]
    widths = [int(f.shape[1]) for f in flats]
    total_w = sum(widths)

    # Row-tile selection: multiple of the dtype's sublane count, divides N,
    # and keeps the output block around ~2 MiB (inputs+output+double buffers
    # then stay under the smallest default scoped-VMEM limit, v5e's 16 MiB).
    sub = _sublane_multiple(dtype)
    row_bytes = total_w * itemsize
    budget = 2 << 20

    tile_n = lead  # full-height block is always layout-legal
    if lead % sub == 0:
        best = sub
        t = sub
        while t <= lead and t * row_bytes <= budget:
            if lead % t == 0:
                best = t
            t += sub
        tile_n = best
    # TODO(synk): if N is very large and not a multiple of the sublane count,
    # this falls back to a single full-height block which may exceed VMEM.

    grid = (lead // tile_n,)
    kernel = _make_cat_kernel(widths)

    out_flat = pl.pallas_call(
        kernel,
        out_shape=jax.ShapeDtypeStruct((lead, total_w), dtype),
        grid=grid,
        in_specs=[pl.BlockSpec((tile_n, w), lambda i: (i, 0)) for w in widths],
        out_specs=pl.BlockSpec((tile_n, total_w), lambda i: (i, 0)),
        compiler_params=pltpu.CompilerParams(
            dimension_semantics=("parallel",),
        ),
    )(*flats)

    return out_flat.reshape(out_nd_shape)


if __name__ == "__main__":
    key = jax.random.PRNGKey(0)
    k0, k1, k2 = jax.random.split(key, 3)

    # NCHW feature maps, concatenated along the channel dim.
    x0 = jax.random.normal(k0, (2, 4, 16, 16), dtype=jnp.float32)
    x1 = jax.random.normal(k1, (2, 4, 16, 16), dtype=jnp.float32)

    out = cat_dim1([x0, x1], force_kernel=True)
    out = jax.block_until_ready(out)
    ref = jnp.concatenate([x0, x1], axis=1)
    assert out.shape == ref.shape and out.dtype == ref.dtype
    assert jnp.array_equal(out, ref)

    # Unequal channel counts + three inputs.
    x2 = jax.random.normal(k2, (2, 6, 16, 16), dtype=jnp.float32)
    out2 = jax.block_until_ready(cat_dim1([x0, x2, x1], force_kernel=True))
    ref2 = jnp.concatenate([x0, x2, x1], axis=1)
    assert out2.shape == ref2.shape
    assert jnp.array_equal(out2, ref2)

    print("KERNEL_OK")
</pallas_src>

<mosaic_0001>
module attributes {stable_mosaic.version = 11 : i64} {
  func.func @kernel(%arg0: i32, %arg1: memref<2x1024xf32, #tpu.memory_space<vmem>>, %arg2: memref<2x1024xf32, #tpu.memory_space<vmem>>, %arg3: memref<2x2048xf32, #tpu.memory_space<vmem>>) attributes {dimension_semantics = [#tpu.dimension_semantics<parallel>], iteration_bounds = array<i64: 1>, scalar_prefetch = 0 : i64, scratch_operands = 0 : i64, tpu.core_type = #tpu.core_type<tc>, window_params = [{transform_indices = @transform_0, window_bounds = array<i64: 2, 1024>}, {transform_indices = @transform_1, window_bounds = array<i64: 2, 1024>}, {transform_indices = @transform_2, window_bounds = array<i64: 2, 2048>}]} {
    %c0 = arith.constant 0 : index
    %c0_0 = arith.constant 0 : index
    %0 = vector.load %arg1[%c0, %c0_0] : memref<2x1024xf32, #tpu.memory_space<vmem>>, vector<2x1024xf32>
    %c0_1 = arith.constant 0 : index
    %c0_2 = arith.constant 0 : index
    %1 = vector.load %arg3[%c0_1, %c0_2] : memref<2x2048xf32, #tpu.memory_space<vmem>>, vector<2x1024xf32>
    tpu.vector_store %arg3[%c0_1, %c0_2], %0 {strides = array<i32>} : memref<2x2048xf32, #tpu.memory_space<vmem>>, vector<2x1024xf32>,
    %c0_3 = arith.constant 0 : index
    %c0_4 = arith.constant 0 : index
    %2 = vector.load %arg2[%c0_3, %c0_4] : memref<2x1024xf32, #tpu.memory_space<vmem>>, vector<2x1024xf32>
    %c0_5 = arith.constant 0 : index
    %c1024 = arith.constant 1024 : index
    %3 = vector.load %arg3[%c0_5, %c1024] : memref<2x2048xf32, #tpu.memory_space<vmem>>, vector<2x1024xf32>
    tpu.vector_store %arg3[%c0_5, %c1024], %2 {strides = array<i32>} : memref<2x2048xf32, #tpu.memory_space<vmem>>, vector<2x1024xf32>,
    return
  }
  func.func @transform_0(%arg0: i32) -> (i32, i32) {
    %c0_i32 = arith.constant 0 : i32
    %c0_i32_0 = arith.constant 0 : i32
    return %arg0, %c0_i32 : i32, i32
  }
  func.func @transform_1(%arg0: i32) -> (i32, i32) {
    %c0_i32 = arith.constant 0 : i32
    %c0_i32_0 = arith.constant 0 : i32
    return %arg0, %c0_i32 : i32, i32
  }
  func.func @transform_2(%arg0: i32) -> (i32, i32) {
    %c0_i32 = arith.constant 0 : i32
    %c0_i32_0 = arith.constant 0 : i32
    return %arg0, %c0_i32 : i32, i32
  }
}

</mosaic_0001>

<bundles_post_ra>
// kernel: tpu_custom_call.1
= control target key start
LH: loop header
LB: loop body
LE: loop exit
PB: predicated region body
PF: predicated region fallthrough
CT: control target
= control target key end

     0   :  { %7 = vsyncpa [#allocation3], 0  ;;  %s174_s0 = inlined_call_operand.hbm [shape: f32[2,1024], index: 0, kind: input, shape index: {}]   ;;  %s175_s1 = inlined_call_operand.hbm [shape: f32[2,1024], index: 1, kind: input, shape index: {}]   ;;  %s176_s2 = inlined_call_operand.hbm [shape: f32[2,2048], index: 2, kind: output, shape index: {}]  }
   0x1   :  { %8 = vsyncpa [#allocation6], 0 }
   0x2   :  { %9 = vsyncpa [#allocation4], 0  ;;  %s15_s11 = sshll.u32 %s174_s0, 4  ;;  %s147_s12 = smov [#allocation2]   ;;  %s16_s11 = int_to_ptr.hbm [resolvable:$true] %s15_s11 }
   0x3   :  { %s17_s13 = sshll.u32 %s147_s12, 4  ;;  %s26_s16 = sshll.u32 %s175_s1, 4  ;;  %s18_s13 = int_to_ptr.vmem [resolvable:$true] %s17_s13  ;;  %s27_s16 = int_to_ptr.hbm [resolvable:$true] %s26_s16 }
   0x4   :  { %20 = dma.hbm_to_vmem [thread:$0]  %s16_s11, 256, %s18_s13, [#allocation3]  }
   0x5   :  { %s148_s17 = smov [#allocation5]  }
   0x6   :  { %s28_s18 = sshll.u32 %s148_s17, 4  ;;  %s29_s18 = int_to_ptr.vmem [resolvable:$true] %s28_s18 }
   0x7   :  { %31 = dma.hbm_to_vmem [thread:$0]  %s27_s16, 256, %s29_s18, [#allocation6]  }
   0x8   :  { %141 = dma.done.wait [#allocation3], 256  }
   0x9   :  { %142 = vsyncadd [#allocation3], 4294967040 }
   0xa   :  { %143 = dma.done.wait [#allocation6], 256  }
   0xb   :  { %144 = vsyncadd [#allocation6], 4294967040  ;;  %s149_s19 = smov [#allocation7]   ;;  %s55_s22 = sshll.u32 %s176_s2, 4  ;;  %v40_v0 = vld [vmem:[#allocation2] sm:$0xff]  ;;  %v41_v1 = vld [vmem:[#allocation2 + $0x8] sm:$0xff]  ;;  %s56_s22 = int_to_ptr.hbm [resolvable:$true] %s55_s22 }
   0xc   :  { %s53_s0 = sshll.u32 %s149_s19, 4  ;;  %v44_v2 = vld [vmem:[#allocation5] sm:$0xff]  ;;  %42 = vst [vmem:[#allocation7] sm:$0xff] %v40_v0  ;;  %v45_v3 = vld [vmem:[#allocation5 + $0x8] sm:$0xff]  ;;  %s54_s0 = int_to_ptr.vmem [resolvable:$true] %s53_s0 }
   0xd   :  { %43 = vst [vmem:[#allocation7 + $0x8] sm:$0xff] %v41_v1 }
   0xe   :  { %46 = vst [vmem:[#allocation7 + $0x10] sm:$0xff] %v44_v2 }
   0xf   :  { %47 = vst [vmem:[#allocation7 + $0x18] sm:$0xff] %v45_v3 }
  0x10   :  { %58 = dma.vmem_to_hbm [thread:$0]  %s54_s0, 512, %s56_s22, [#allocation4]  }
  0x11   :  { %145 = dma.done.wait [#allocation4], 512  }
  0x12   :  { %146 = vsyncadd [#allocation4], 4294966784 }
  0x13   :  { %63 = vsyncpa [#allocation3], 1 }
  0x14   :  { %64 = vsyncpa [#allocation6], 1 }
  0x15   :  { %65 = vsyncpa [#allocation4], 1 }

</bundles_post_ra>
